<compile_context>
chip_gen: v7x
topology: tpu7x:2x2x1
jax: 0.10.0
libtpu: 0.0.40
codegen_flags: <defaults>
</compile_context>

<pallas_src>
import functools

import jax
import jax.numpy as jnp
from jax.experimental import pallas as pl
from jax.experimental.pallas import tpu as pltpu


def _se_kernel(x_ref, w1_ref, b1_ref, w2_ref, b2_ref, o_ref, *, inv_hw, bt):
    # x block: (bt, C, HW) — channels on sublanes, spatial on lanes (lane-dense).
    for b in range(bt):  # static unroll over the batch tile (bt <= 8)
        xb = x_ref[b]                                                    # (C, HW)

        # Squeeze: global average pool over the spatial (lane) axis, f32 accumulate.
        pooled = jnp.sum(xb.astype(jnp.float32), axis=1, keepdims=True) * inv_hw  # (C, 1)

        # Excite: Linear -> ReLU6 -> Linear -> ReLU6, all in (., 1) column form.
        h = jnp.dot(w1_ref[...], pooled, preferred_element_type=jnp.float32) + b1_ref[...]
        h = jnp.clip(h, 0.0, 6.0)                                        # (mid, 1)
        s = jnp.dot(w2_ref[...], h, preferred_element_type=jnp.float32) + b2_ref[...]
        s = jnp.clip(s, 0.0, 6.0)                                        # (C, 1)

        # Scale: broadcast the per-channel gate across HW lanes; wide stores.
        o_ref[b] = xb * s.astype(xb.dtype)


def squeeze_and_excite(x_nchw, w1, b1, w2, b2, *, max_block_bytes=1 << 20):
    """SE block.

    x_nchw: (B, C, H, W).
    w1: (mid, C), b1: (mid,)   -- PyTorch nn.Linear(C, mid) layout.
    w2: (C, mid), b2: (C,)     -- PyTorch nn.Linear(mid, C) layout.
    """
    B, C, H, W = x_nchw.shape
    HW = H * W
    mid = w1.shape[0]

    # Zero-copy views: NCHW -> (B, C, HW); biases as columns for the kernel.
    x = x_nchw.reshape(B, C, HW)
    b1c = b1.reshape(mid, 1)
    b2c = b2.reshape(C, 1)

    # Pick the batch tile: largest divisor of B (<= 8) whose slab stays small.
    slab_bytes = C * HW * x.dtype.itemsize
    bt = 1
    for cand in range(1, min(B, 8) + 1):
        if B % cand == 0 and cand * slab_bytes <= max_block_bytes:
            bt = cand

    # Input + output blocks, double-buffered, plus weights + slack.
    block_bytes = bt * slab_bytes
    vmem_limit = int(min(max(4 * block_bytes + (2 << 20), 32 << 20), 48 << 20))
    # TODO(synk): for C*HW slabs larger than ~8 MiB switch to a two-pass
    # HW-tiled grid (pool-accumulate, then scale) instead of a whole-slab block.

    kernel = functools.partial(_se_kernel, inv_hw=1.0 / HW, bt=bt)

    out = pl.pallas_call(
        kernel,
        out_shape=jax.ShapeDtypeStruct((B, C, HW), x.dtype),
        grid_spec=pltpu.PrefetchScalarGridSpec(
            num_scalar_prefetch=0,
            grid=(B // bt,),
            in_specs=[
                pl.BlockSpec((bt, C, HW), lambda i: (i, 0, 0)),   # x slab
                pl.BlockSpec((mid, C), lambda i: (0, 0)),         # W1 (resident)
                pl.BlockSpec((mid, 1), lambda i: (0, 0)),         # b1
                pl.BlockSpec((C, mid), lambda i: (0, 0)),         # W2
                pl.BlockSpec((C, 1), lambda i: (0, 0)),           # b2
            ],
            out_specs=pl.BlockSpec((bt, C, HW), lambda i: (i, 0, 0)),
        ),
        input_output_aliases={0: 0},  # output reuses x's HBM buffer
        compiler_params=pltpu.CompilerParams(
            dimension_semantics=("parallel",),
            vmem_limit_bytes=vmem_limit,
        ),
    )(x, w1, b1c, w2, b2c)

    # (B, C, HW) -> (B, C, H, W): zero-copy view.
    return out.reshape(B, C, H, W)


def _reference(x_nchw, w1, b1, w2, b2):
    pooled = jnp.mean(x_nchw, axis=(2, 3))                        # (B, C)
    h = jnp.clip(pooled @ w1.T + b1, 0.0, 6.0)
    s = jnp.clip(h @ w2.T + b2, 0.0, 6.0)                         # (B, C)
    return x_nchw * s[:, :, None, None]


if __name__ == "__main__":
    B, C, H, W = 2, 4, 16, 16
    divide = 4
    mid = C // divide  # 1

    key = jax.random.PRNGKey(0)
    kx, k1, k2, k3, k4 = jax.random.split(key, 5)

    x = jax.random.normal(kx, (B, C, H, W), dtype=jnp.float32)
    # PyTorch nn.Linear(in, out) weight layout: (out, in).
    w1 = jax.random.normal(k1, (mid, C), dtype=jnp.float32) * 0.1
    b1 = jax.random.normal(k2, (mid,), dtype=jnp.float32) * 0.1
    w2 = jax.random.normal(k3, (C, mid), dtype=jnp.float32) * 0.1
    b2 = jax.random.normal(k4, (C,), dtype=jnp.float32) * 0.1

    ref = _reference(x, w1, b1, w2, b2)

    # Batched path: bt = 2 -> single grid step moving the whole (2, C, HW) slab.
    out = squeeze_and_excite(x, w1, b1, w2, b2)
    jax.block_until_ready(out)
    assert out.shape == (B, C, H, W)
    assert jnp.allclose(out, ref, atol=1e-5, rtol=1e-5)

    # Multi-step path: force bt = 1 (grid = B) to validate the pipelined loop.
    out2 = squeeze_and_excite(x, w1, b1, w2, b2, max_block_bytes=2048)
    jax.block_until_ready(out2)
    assert jnp.allclose(out2, ref, atol=1e-5, rtol=1e-5)

    print("KERNEL_OK")
</pallas_src>

<mosaic_0001>
module attributes {stable_mosaic.version = 11 : i64} {
  func.func @_se_kernel(%arg0: i32, %arg1: memref<2x4x256xf32, #tpu.memory_space<vmem>>, %arg2: memref<1x4xf32, #tpu.memory_space<vmem>>, %arg3: memref<1x1xf32, #tpu.memory_space<vmem>>, %arg4: memref<4x1xf32, #tpu.memory_space<vmem>>, %arg5: memref<4x1xf32, #tpu.memory_space<vmem>>, %arg6: memref<2x4x256xf32, #tpu.memory_space<vmem>>) attributes {dimension_semantics = [#tpu.dimension_semantics<parallel>], iteration_bounds = array<i64: 1>, scalar_prefetch = 0 : i64, scratch_operands = 0 : i64, tpu.core_type = #tpu.core_type<tc>, window_params = [{transform_indices = @transform_0, window_bounds = array<i64: 2, 4, 256>}, {pipeline_mode = #tpu.pipeline_mode<synchronous>, transform_indices = @transform_1, window_bounds = array<i64: 1, 4>}, {pipeline_mode = #tpu.pipeline_mode<synchronous>, transform_indices = @transform_2, window_bounds = array<i64: 1, 1>}, {pipeline_mode = #tpu.pipeline_mode<synchronous>, transform_indices = @transform_3, window_bounds = array<i64: 4, 1>}, {pipeline_mode = #tpu.pipeline_mode<synchronous>, transform_indices = @transform_4, window_bounds = array<i64: 4, 1>}, {transform_indices = @transform_5, window_bounds = array<i64: 2, 4, 256>}]} {
    %c0 = arith.constant 0 : index
    %c0_0 = arith.constant 0 : index
    %c0_1 = arith.constant 0 : index
    %0 = vector.load %arg1[%c0, %c0_0, %c0_1] : memref<2x4x256xf32, #tpu.memory_space<vmem>>, vector<1x4x256xf32>
    %1 = vector.shape_cast %0 : vector<1x4x256xf32> to vector<4x256xf32>
    %cst = arith.constant dense<0.000000e+00> : vector<4xf32>
    %2 = vector.multi_reduction <add>, %1, %cst [1] : vector<4x256xf32> to vector<4xf32>
    %3 = vector.shape_cast %2 : vector<4xf32> to vector<4x1xf32>
    %cst_2 = arith.constant 3.906250e-03 : f32
    %4 = vector.broadcast %cst_2 : f32 to vector<4x1xf32>
    %5 = arith.mulf %3, %4 : vector<4x1xf32>
    %c0_3 = arith.constant 0 : index
    %c0_4 = arith.constant 0 : index
    %6 = vector.load %arg2[%c0_3, %c0_4] : memref<1x4xf32, #tpu.memory_space<vmem>>, vector<1x4xf32>
    %cst_5 = arith.constant dense<0.000000e+00> : vector<1x1xf32>
    %7 = tpu.matmul %6, %5, %cst_5 {dimension_numbers = #tpu.dot_dimension_numbers<[1], [0], [0], [1], [0, 0, 1, 1], [], []>} : vector<1x4xf32>, vector<4x1xf32>, vector<1x1xf32> -> vector<1x1xf32>
    %c0_6 = arith.constant 0 : index
    %c0_7 = arith.constant 0 : index
    %8 = vector.load %arg3[%c0_6, %c0_7] : memref<1x1xf32, #tpu.memory_space<vmem>>, vector<1x1xf32>
    %9 = arith.addf %7, %8 : vector<1x1xf32>
    %cst_8 = arith.constant 0.000000e+00 : f32
    %cst_9 = arith.constant 6.000000e+00 : f32
    %10 = vector.broadcast %cst_8 : f32 to vector<1x1xf32>
    %11 = arith.maximumf %10, %9 : vector<1x1xf32>
    %12 = vector.broadcast %cst_9 : f32 to vector<1x1xf32>
    %13 = arith.minimumf %12, %11 : vector<1x1xf32>
    %c0_10 = arith.constant 0 : index
    %c0_11 = arith.constant 0 : index
    %14 = vector.load %arg4[%c0_10, %c0_11] : memref<4x1xf32, #tpu.memory_space<vmem>>, vector<4x1xf32>
    %cst_12 = arith.constant dense<0.000000e+00> : vector<4x1xf32>
    %15 = tpu.matmul %14, %13, %cst_12 {dimension_numbers = #tpu.dot_dimension_numbers<[1], [0], [0], [1], [0, 0, 1, 1], [], []>} : vector<4x1xf32>, vector<1x1xf32>, vector<4x1xf32> -> vector<4x1xf32>
    %c0_13 = arith.constant 0 : index
    %c0_14 = arith.constant 0 : index
    %16 = vector.load %arg5[%c0_13, %c0_14] : memref<4x1xf32, #tpu.memory_space<vmem>>, vector<4x1xf32>
    %17 = arith.addf %15, %16 : vector<4x1xf32>
    %cst_15 = arith.constant 0.000000e+00 : f32
    %cst_16 = arith.constant 6.000000e+00 : f32
    %18 = vector.broadcast %cst_15 : f32 to vector<4x1xf32>
    %19 = arith.maximumf %18, %17 : vector<4x1xf32>
    %20 = vector.broadcast %cst_16 : f32 to vector<4x1xf32>
    %21 = arith.minimumf %20, %19 : vector<4x1xf32>
    %22 = vector.broadcast %21 : vector<4x1xf32> to vector<4x256xf32>
    %23 = arith.mulf %1, %22 : vector<4x256xf32>
    %c0_17 = arith.constant 0 : index
    %c0_18 = arith.constant 0 : index
    %c0_19 = arith.constant 0 : index
    %24 = vector.load %arg6[%c0_17, %c0_18, %c0_19] : memref<2x4x256xf32, #tpu.memory_space<vmem>>, vector<1x4x256xf32>
    %25 = vector.shape_cast %24 : vector<1x4x256xf32> to vector<4x256xf32>
    %26 = vector.shape_cast %23 : vector<4x256xf32> to vector<1x4x256xf32>
    tpu.vector_store %arg6[%c0_17, %c0_18, %c0_19], %26 {strides = array<i32>} : memref<2x4x256xf32, #tpu.memory_space<vmem>>, vector<1x4x256xf32>,
    %c1 = arith.constant 1 : index
    %c0_20 = arith.constant 0 : index
    %c0_21 = arith.constant 0 : index
    %27 = vector.load %arg1[%c1, %c0_20, %c0_21] : memref<2x4x256xf32, #tpu.memory_space<vmem>>, vector<1x4x256xf32>
    %28 = vector.shape_cast %27 : vector<1x4x256xf32> to vector<4x256xf32>
    %cst_22 = arith.constant dense<0.000000e+00> : vector<4xf32>
    %29 = vector.multi_reduction <add>, %28, %cst_22 [1] : vector<4x256xf32> to vector<4xf32>
    %30 = vector.shape_cast %29 : vector<4xf32> to vector<4x1xf32>
    %cst_23 = arith.constant 3.906250e-03 : f32
    %31 = vector.broadcast %cst_23 : f32 to vector<4x1xf32>
    %32 = arith.mulf %30, %31 : vector<4x1xf32>
    %c0_24 = arith.constant 0 : index
    %c0_25 = arith.constant 0 : index
    %33 = vector.load %arg2[%c0_24, %c0_25] : memref<1x4xf32, #tpu.memory_space<vmem>>, vector<1x4xf32>
    %cst_26 = arith.constant dense<0.000000e+00> : vector<1x1xf32>
    %34 = tpu.matmul %33, %32, %cst_26 {dimension_numbers = #tpu.dot_dimension_numbers<[1], [0], [0], [1], [0, 0, 1, 1], [], []>} : vector<1x4xf32>, vector<4x1xf32>, vector<1x1xf32> -> vector<1x1xf32>
    %c0_27 = arith.constant 0 : index
    %c0_28 = arith.constant 0 : index
    %35 = vector.load %arg3[%c0_27, %c0_28] : memref<1x1xf32, #tpu.memory_space<vmem>>, vector<1x1xf32>
    %36 = arith.addf %34, %35 : vector<1x1xf32>
    %cst_29 = arith.constant 0.000000e+00 : f32
    %cst_30 = arith.constant 6.000000e+00 : f32
    %37 = vector.broadcast %cst_29 : f32 to vector<1x1xf32>
    %38 = arith.maximumf %37, %36 : vector<1x1xf32>
    %39 = vector.broadcast %cst_30 : f32 to vector<1x1xf32>
    %40 = arith.minimumf %39, %38 : vector<1x1xf32>
    %c0_31 = arith.constant 0 : index
    %c0_32 = arith.constant 0 : index
    %41 = vector.load %arg4[%c0_31, %c0_32] : memref<4x1xf32, #tpu.memory_space<vmem>>, vector<4x1xf32>
    %cst_33 = arith.constant dense<0.000000e+00> : vector<4x1xf32>
    %42 = tpu.matmul %41, %40, %cst_33 {dimension_numbers = #tpu.dot_dimension_numbers<[1], [0], [0], [1], [0, 0, 1, 1], [], []>} : vector<4x1xf32>, vector<1x1xf32>, vector<4x1xf32> -> vector<4x1xf32>
    %c0_34 = arith.constant 0 : index
    %c0_35 = arith.constant 0 : index
    %43 = vector.load %arg5[%c0_34, %c0_35] : memref<4x1xf32, #tpu.memory_space<vmem>>, vector<4x1xf32>
    %44 = arith.addf %42, %43 : vector<4x1xf32>
    %cst_36 = arith.constant 0.000000e+00 : f32
    %cst_37 = arith.constant 6.000000e+00 : f32
    %45 = vector.broadcast %cst_36 : f32 to vector<4x1xf32>
    %46 = arith.maximumf %45, %44 : vector<4x1xf32>
    %47 = vector.broadcast %cst_37 : f32 to vector<4x1xf32>
    %48 = arith.minimumf %47, %46 : vector<4x1xf32>
    %49 = vector.broadcast %48 : vector<4x1xf32> to vector<4x256xf32>
    %50 = arith.mulf %28, %49 : vector<4x256xf32>
    %c1_38 = arith.constant 1 : index
    %c0_39 = arith.constant 0 : index
    %c0_40 = arith.constant 0 : index
    %51 = vector.load %arg6[%c1_38, %c0_39, %c0_40] : memref<2x4x256xf32, #tpu.memory_space<vmem>>, vector<1x4x256xf32>
    %52 = vector.shape_cast %51 : vector<1x4x256xf32> to vector<4x256xf32>
    %53 = vector.shape_cast %50 : vector<4x256xf32> to vector<1x4x256xf32>
    tpu.vector_store %arg6[%c1_38, %c0_39, %c0_40], %53 {strides = array<i32>} : memref<2x4x256xf32, #tpu.memory_space<vmem>>, vector<1x4x256xf32>,
    return
  }
  func.func @transform_0(%arg0: i32) -> (i32, i32, i32) {
    %c0_i32 = arith.constant 0 : i32
    %c0_i32_0 = arith.constant 0 : i32
    %c0_i32_1 = arith.constant 0 : i32
    return %arg0, %c0_i32, %c0_i32_0 : i32, i32, i32
  }
  func.func @transform_1(%arg0: i32) -> (i32, i32) {
    %c0_i32 = arith.constant 0 : i32
    %c0_i32_0 = arith.constant 0 : i32
    %c0_i32_1 = arith.constant 0 : i32
    return %c0_i32, %c0_i32_0 : i32, i32
  }
  func.func @transform_2(%arg0: i32) -> (i32, i32) {
    %c0_i32 = arith.constant 0 : i32
    %c0_i32_0 = arith.constant 0 : i32
    %c0_i32_1 = arith.constant 0 : i32
    return %c0_i32, %c0_i32_0 : i32, i32
  }
  func.func @transform_3(%arg0: i32) -> (i32, i32) {
    %c0_i32 = arith.constant 0 : i32
    %c0_i32_0 = arith.constant 0 : i32
    %c0_i32_1 = arith.constant 0 : i32
    return %c0_i32, %c0_i32_0 : i32, i32
  }
  func.func @transform_4(%arg0: i32) -> (i32, i32) {
    %c0_i32 = arith.constant 0 : i32
    %c0_i32_0 = arith.constant 0 : i32
    %c0_i32_1 = arith.constant 0 : i32
    return %c0_i32, %c0_i32_0 : i32, i32
  }
  func.func @transform_5(%arg0: i32) -> (i32, i32, i32) {
    %c0_i32 = arith.constant 0 : i32
    %c0_i32_0 = arith.constant 0 : i32
    %c0_i32_1 = arith.constant 0 : i32
    return %arg0, %c0_i32, %c0_i32_0 : i32, i32, i32
  }
}

</mosaic_0001>

<bundles_post_ra>
// kernel: tpu_custom_call.1
= control target key start
LH: loop header
LB: loop body
LE: loop exit
PB: predicated region body
PF: predicated region fallthrough
CT: control target
= control target key end

     0   :  { %s635_s0 = inlined_call_operand.hbm [shape: f32[2,4,256], index: 0, kind: input, shape index: {}, may-alias: {0,5}]   ;;  %s636_s1 = inlined_call_operand.vmem [shape: f32[1,4], index: 1, kind: input, shape index: {}]   ;;  %s637_s2 = inlined_call_operand.<no memory space> [shape: f32[1,1], index: 2, kind: input, shape index: {}]   ;;  %s638_s3 = inlined_call_operand.vmem [shape: f32[4,1], index: 3, kind: input, shape index: {}]   ;;  %s639_s4 = inlined_call_operand.vmem [shape: f32[4,1], index: 4, kind: input, shape index: {}]   ;;  %s640_s5 = inlined_call_operand.hbm [shape: f32[2,4,256], index: 5, kind: output, shape index: {}, may-alias: {0,5}]  }
   0x1   :  { %v10_v0 = vstv %s637_s2 }
   0x2   :  { %11 = vst [vmem:[#allocation2] sm:$0x1] %v10_v0 }
   0x3   :  { %12 = vsyncpa [#allocation4], 0 }
   0x4   :  { %13 = vsyncpa [#allocation5], 0  ;;  %s524_s20 = smov [#allocation3]   ;;  %s476_s24 = scalar_lea.hbm %s635_s0, 256 }
   0x5   :  { %s19_s21 = sshll.u32 %s524_s20, 4  ;;  %p477_p0 = scmp.ne.s32.totalorder %s635_s0, %s476_s24  ;;  %s20_s21 = int_to_ptr.vmem [resolvable:$true] %s19_s21 }
   0x6   :  { %p480_p1 = scmp.lt.u32.totalorder %s476_s24, %s635_s0 }
   0x8   :  { %p482_p2 = pnand %p480_p1, %p477_p0 }
   0xa   :  { %485 = shalt.err (!%p482_p2)
}
   0xb   :  { %s486_s2 = scalar_lea.vmem %s20_s21, 256  ;;  %p491_p4 = scmp.lt.s32.totalorder %s20_s21, %s20_s21 }
   0xc   :  { %p487_p3 = scmp.ne.s32.totalorder %s20_s21, %s486_s2  ;;  %p492_p5 = scmp.lt.s32.totalorder %s486_s2, %s486_s2 }
   0xe   :  { %p493_p6 = por %p492_p5, %p491_p4 }
  0x10   :  { %p494_p7 = pnand %p493_p6, %p487_p3 }
  0x12   :  { %497 = shalt.err (!%p494_p7)
}
  0x13   :  { %s525_s29 = smov 128   ;;  %s526_s30 = smov 8  }
  0x14   :  { %25 = dma.hbm_to_vmem [thread:$0]  %s635_s0, 256, %s20_s21, [#allocation4], %s525_s29, %s525_s29, %s526_s30  }
  0x15   :  { %520 = dma.done.wait [#allocation4], 256  }
  0x16   :  { %521 = vsyncadd [#allocation4], 4294967040  ;;  %vm41_vm0 = vcmask 1043456   ;;  %v580_v1 = vld [vmem:[#allocation3] sm:$0xff]  ;;  %v582_v2 = vld [vmem:[#allocation3 + $0x8] sm:$0xff]  ;;  %v527_v11 = vmov 0.0   ;;  %v218_v47 = vlaneseq }
  0x17   :  { %v39_v3 = vcombine.high %v580_v1, %v580_v1  ;;  %v42_v4 = vsel %vm41_vm0, %v580_v1, 0.0  ;;  %v228_v5 = vcombine.high %v582_v2, %v582_v2  ;;  %v230_v7 = vsel %vm41_vm0, %v582_v2, 0.0  ;;  %444 = vmatprep.subr.mxu0 %v527_v11  ;;  %449 = vmatprep.subr.mxu1 %v527_v11  ;;  %v48_v14 = vld [vmem:[%s636_s1] sm:$0x1] }
  0x18   :  { %vm528_vm1 = vmmov 0   ;;  %vm50_vm2 = vcmask 31744   ;;  %v236_v17 = vld [vmem:[%s636_s1] sm:$0x1]  ;;  %vm135_vm3 = vcmask 1040384   ;;  %vm131_vm4 = vcmask 7168  }
  0x19   :  { %v43_v6 = vsel %vm41_vm0, %v39_v3, 0.0  ;;  %v231_v8 = vsel %vm41_vm0, %v228_v5, 0.0  ;;  %446 = vmatprep.mubr.msk.f32.mxu0 %vm528_vm1, %v527_v11  ;;  %451 = vmatprep.mubr.msk.f32.mxu1 %vm528_vm1, %v527_v11  ;;  %v49_v18 = vld [vmem:[#allocation2] sm:$0x1]  ;;  %v529_v32 = vmov 0   ;;  %v219_v49 = vshrl.u32 %v218_v47, 7 }
  0x1a   :  { %v44_v9 = vadd.f32 %v43_v6, %v42_v4  ;;  %v232_v10 = vadd.f32 %v231_v8, %v230_v7  ;;  %v237_v22 = vld [vmem:[#allocation2] sm:$0x1]  ;;  %472 = vset.pattern.permute.xlu1 %v529_v32  ;;  %473 = vset.pattern.permute.xlu0 %v529_v32  ;;  %v530_v45 = vmov 839922192  }
  0x1b   :  { %v129_v28 = vld [vmem:[%s638_s3] sm:$0xf]  ;;  %v216_v46 = vunpack.c.l.s4 %v530_v45 }
  0x1c   :  { %45 = vadd.xlane.f32.xlu0 %v44_v9  ;;  %v316_v31 = vld [vmem:[%s638_s3] sm:$0xf]  ;;  %s531_s3 = smov [#allocation6]  }
  0x1d   :  { %v130_v33 = vld [vmem:[%s639_s4] sm:$0xf]  ;;  %v217_v48 = vunpack.c.0.s8 %v216_v46 }
  0x1e   :  { %v317_v37 = vld [vmem:[%s639_s4] sm:$0xf]  ;;  %s416_s4 = sshll.u32 %s531_s3, 4  ;;  %s417_s4 = int_to_ptr.vmem [resolvable:$true] %s416_s4 }
  0x1f   :  { %v220_v50 = vsub.s32 %v217_v48, %v219_v49  ;;  %s498_s18 = scalar_lea.vmem %s417_s4, 256  ;;  %p503_p9 = scmp.lt.s32.totalorder %s417_s4, %s417_s4 }
  0x20   :  { %233 = vadd.xlane.f32.xlu0 %v232_v10  ;;  %p499_p8 = scmp.ne.s32.totalorder %s417_s4, %s498_s18  ;;  %p504_p10 = scmp.lt.s32.totalorder %s498_s18, %s498_s18 }
  0x22   :  { %p505_p11 = por %p504_p10, %p503_p9 }
  0x24   :  { %p506_p12 = pnand %p505_p11, %p499_p8 }
  0xa9   :  { %v46_v12 = vpop.xlane.xlu0 %45 }
  0xaa   :  { %v47_v13 = vmul.f32 0.00390625, %v46_v12 }
  0xac   :  { %445 = vmatpush3.msk.msra.mxu0 %vm41_vm0, %v47_v13 }
  0xad   :  { %447 = vmatmul.mubr.msk.f32.vlgmr.msra.gmra.mrb[0].mxu0 %vm50_vm2, %v48_v14  ;;  %v234_v15 = vpop.xlane.xlu0 %233  ;;  %454 = vmatprep.subr.mxu0 %v527_v11 }
  0xae   :  { %v235_v16 = vmul.f32 0.00390625, %v234_v15  ;;  %456 = vmatprep.mubr.msk.f32.mxu0 %vm528_vm1, %v527_v11 }
  0xb0   :  { %455 = vmatpush3.msk.msra.mxu0 %vm41_vm0, %v235_v16 }
  0xb1   :  { %457 = vmatmul.mubr.msk.f32.vlgmr.msra.gmra.mrb[2].mxu0 %vm50_vm2, %v236_v17 }
 0x180   :  { %v123_v19 = vpop.f32.mrb[0].mxu0 }
 0x181   :  { %v124_v20 = vadd.f32 %v123_v19, %v49_v18  ;;  %v448_v21 = vpop.f32.mrb[1].mxu0 }
 0x183   :  { %v127_v23 = vmax.f32 %v124_v20, 0.0 }
 0x184   :  { %v310_v24 = vpop.f32.mrb[2].mxu0 }
 0x185   :  { %v128_v25 = vmin.f32 %v127_v23, 6.0  ;;  %v311_v26 = vadd.f32 %v310_v24, %v237_v22  ;;  %v458_v27 = vpop.f32.mrb[3].mxu0 }
 0x187   :  { %v314_v29 = vmax.f32 %v311_v26, 0.0  ;;  %450 = vmatpush3.msk.msra.mxu1 %vm135_vm3, %v128_v25 }
 0x188   :  { %452 = vmatmul.mubr.msk.f32.vlgmr.msra.gmra.mrb[0].mxu1 %vm131_vm4, %v129_v28  ;;  %459 = vmatprep.subr.mxu1 %v527_v11 }
 0x189   :  { %v315_v30 = vmin.f32 %v314_v29, 6.0  ;;  %461 = vmatprep.mubr.msk.f32.mxu1 %vm528_vm1, %v527_v11 }
 0x18b   :  { %460 = vmatpush3.msk.msra.mxu1 %vm135_vm3, %v315_v30 }
 0x18c   :  { %462 = vmatmul.mubr.msk.f32.vlgmr.msra.gmra.mrb[2].mxu1 %vm131_vm4, %v316_v31 }
 0x25b   :  { %v205_v34 = vpop.f32.mrb[0].mxu1 }
 0x25c   :  { %v206_v35 = vadd.f32 %v205_v34, %v130_v33  ;;  %v453_v36 = vpop.f32.mrb[1].mxu1 }
 0x25e   :  { %v209_v38 = vmax.f32 %v206_v35, 0.0 }
 0x25f   :  { %v390_v39 = vpop.f32.mrb[2].mxu1 }
 0x260   :  { %v391_v40 = vadd.f32 %v390_v39, %v317_v37  ;;  %v210_v41 = vmin.f32 %v209_v38, 6.0  ;;  %v463_v42 = vpop.f32.mrb[3].mxu1 }
 0x262   :  { %v394_v43 = vmax.f32 %v391_v40, 0.0  ;;  %213 = vperm.xlu1 %472, %v210_v41  }
 0x264   :  { %v395_v44 = vmin.f32 %v394_v43, 6.0 }
 0x266   :  { %398 = vperm.xlu1 %472, %v395_v44  }
 0x2e1   :  { %v214_v51 = vpop.permute.xlu1 %213 }
 0x2e2   :  { %v221_v52 = vrot.slane %v214_v51, %v220_v50 }
 0x2e4   :  { %v223_v53 = vmul.f32 %v221_v52, %v580_v1 }
 0x2e5   :  { %v399_v54 = vpop.permute.xlu1 %398 }
 0x2e6   :  { %224 = vst [vmem:[#allocation6] sm:$0xff] %v223_v53  ;;  %v406_v55 = vrot.slane %v399_v54, %v220_v50 }
 0x2e8   :  { %v408_v56 = vmul.f32 %v406_v55, %v582_v2 }
 0x2ea   :  { %410 = vst [vmem:[#allocation6 + $0x8] sm:$0xff] %v408_v56 }
 0x2eb   :  { %509 = shalt.err (!%p506_p12)
}
 0x2ec   :  { %s510_s21 = scalar_lea.hbm %s640_s5, 256 }
 0x2ed   :  { %p511_p13 = scmp.ne.s32.totalorder %s640_s5, %s510_s21  ;;  %p514_p0 = scmp.lt.u32.totalorder %s510_s21, %s640_s5 }
 0x2ef   :  { %p516_p1 = pnand %p514_p0, %p511_p13 }
 0x2f1   :  { %519 = shalt.err (!%p516_p1)
}
 0x2f2   :  { %422 = dma.vmem_to_hbm [thread:$0]  %s417_s4, 256, %s640_s5, [#allocation5], %s525_s29, %s525_s29, %s526_s30  }
 0x2f3   :  { %522 = dma.done.wait [#allocation5], 256  }
 0x2f4   :  { %523 = vsyncadd [#allocation5], 4294967040 }
 0x2f5   :  { %426 = vsyncpa [#allocation4], 1 }
 0x2f6   :  { %427 = vsyncpa [#allocation5], 1 }

</bundles_post_ra>
